<compile_context>
chip_gen: v7x
topology: tpu7x:2x2x1
jax: 0.10.0
libtpu: 0.0.40
codegen_flags: <defaults>
</compile_context>

<pallas_src>
import jax
import jax.numpy as jnp
from jax.experimental import pallas as pl
from jax.experimental.pallas import tpu as pltpu


def _sigmoid_kernel(x_ref, o_ref):
    # Elementwise sigmoid on the VMEM tile.  tanh form -> one EUP op.
    x = x_ref[...].astype(jnp.float32)
    y = 0.5 * jnp.tanh(0.5 * x) + 0.5
    o_ref[...] = y.astype(o_ref.dtype)


# Wide lane-dense widths to try (largest first).  Must be multiples of 128.
_LANE_WIDTHS = (2048, 1024, 512, 256, 128)
# ~2 MiB per tile: with double-buffered input + output that is ~8 MiB of VMEM,
# safe on every generation's default scoped-VMEM limit.
_TARGET_TILE_BYTES = 2 * 1024 * 1024


def cnn_forward(x):
    """Applies Sigmoid elementwise, matching CNN.forward semantics.

    x: jnp.ndarray (any shape, e.g. NCHW).  Returns same shape/dtype.
    """
    orig_shape = x.shape
    dtype = x.dtype
    n = x.size
    if n == 0:
        return x

    # Pick a wide lane-dense 2-D *view* of the contiguous data (reshape only,
    # no pad / no slice -> no extra HBM round trips).
    lane_w = None
    for w in _LANE_WIDTHS:
        if n % w == 0:
            lane_w = w
            break
    if lane_w is None:
        # Irregular element count: fall back to an (n, 1) row layout.  Still
        # no padding copies; stores are narrow but this path is rare/tiny.
        lane_w = 1
    rows = n // lane_w

    arr2d = x.reshape(rows, lane_w)  # free for a contiguous array

    itemsize = jnp.dtype(dtype).itemsize
    tile_r = max(1, _TARGET_TILE_BYTES // (lane_w * itemsize))
    if tile_r >= rows:
        # Single block along rows (block dim == full dim -> always legal,
        # regardless of the (8,128) divisibility rule).
        tile_r = rows
    else:
        # Multiple of 8 sublanes; uneven tail block is handled (masked) by
        # Pallas, which is fine for a pure elementwise op.
        tile_r = max(8, (tile_r // 8) * 8)

    grid = (pl.cdiv(rows, tile_r),)

    out2d = pl.pallas_call(
        _sigmoid_kernel,
        out_shape=jax.ShapeDtypeStruct((rows, lane_w), dtype),
        grid=grid,
        in_specs=[pl.BlockSpec((tile_r, lane_w), lambda i: (i, 0))],
        out_specs=pl.BlockSpec((tile_r, lane_w), lambda i: (i, 0)),
        compiler_params=pltpu.CompilerParams(
            dimension_semantics=("parallel",)),
        cost_estimate=pl.CostEstimate(
            flops=5 * n,
            transcendentals=n,
            bytes_accessed=2 * n * itemsize),
    )(arr2d)

    return out2d.reshape(orig_shape)


if __name__ == "__main__":
    key = jax.random.PRNGKey(0)
    # Mirror the original script's `torch.reshape(input, (-1, 1, 2, 2))`:
    # 1024 elements -> NCHW shape (256, 1, 2, 2).
    raw = jax.random.normal(key, (256, 4), dtype=jnp.float32)
    x = raw.reshape(-1, 1, 2, 2)

    y = cnn_forward(x)
    jax.block_until_ready(y)

    # Correctness check against plain-JAX reference.
    ref = jax.nn.sigmoid(x)
    assert y.shape == x.shape and y.dtype == x.dtype
    assert jnp.allclose(y, ref, atol=1e-5), "mismatch vs reference sigmoid"

    print("KERNEL_OK")
</pallas_src>

<mosaic_0001>
module attributes {stable_mosaic.version = 11 : i64} {
  func.func @_sigmoid_kernel(%arg0: i32, %arg1: memref<1x1024xf32, #tpu.memory_space<vmem>>, %arg2: memref<1x1024xf32, #tpu.memory_space<vmem>>) attributes {dimension_semantics = [#tpu.dimension_semantics<parallel>], iteration_bounds = array<i64: 1>, scalar_prefetch = 0 : i64, scratch_operands = 0 : i64, tpu.core_type = #tpu.core_type<tc>, window_params = [{transform_indices = @transform_0, window_bounds = array<i64: 1, 1024>}, {transform_indices = @transform_1, window_bounds = array<i64: 1, 1024>}]} {
    %c0 = arith.constant 0 : index
    %c0_0 = arith.constant 0 : index
    %0 = vector.load %arg1[%c0, %c0_0] : memref<1x1024xf32, #tpu.memory_space<vmem>>, vector<1x1024xf32>
    %cst = arith.constant 5.000000e-01 : f32
    %1 = vector.broadcast %cst : f32 to vector<1x1024xf32>
    %2 = arith.mulf %1, %0 : vector<1x1024xf32>
    %3 = math.tanh %2 : vector<1x1024xf32>
    %cst_1 = arith.constant 5.000000e-01 : f32
    %4 = vector.broadcast %cst_1 : f32 to vector<1x1024xf32>
    %5 = arith.mulf %4, %3 : vector<1x1024xf32>
    %cst_2 = arith.constant 5.000000e-01 : f32
    %6 = vector.broadcast %cst_2 : f32 to vector<1x1024xf32>
    %7 = arith.addf %5, %6 : vector<1x1024xf32>
    %c0_3 = arith.constant 0 : index
    %c0_4 = arith.constant 0 : index
    %8 = vector.load %arg2[%c0_3, %c0_4] : memref<1x1024xf32, #tpu.memory_space<vmem>>, vector<1x1024xf32>
    tpu.vector_store %arg2[%c0_3, %c0_4], %7 {strides = array<i32>} : memref<1x1024xf32, #tpu.memory_space<vmem>>, vector<1x1024xf32>,
    return
  }
  func.func @transform_0(%arg0: i32) -> (i32, i32) {
    %c0_i32 = arith.constant 0 : i32
    %c0_i32_0 = arith.constant 0 : i32
    return %arg0, %c0_i32 : i32, i32
  }
  func.func @transform_1(%arg0: i32) -> (i32, i32) {
    %c0_i32 = arith.constant 0 : i32
    %c0_i32_0 = arith.constant 0 : i32
    return %arg0, %c0_i32 : i32, i32
  }
}

</mosaic_0001>

<bundles_post_ra>
// kernel: tpu_custom_call.1
= control target key start
LH: loop header
LB: loop body
LE: loop exit
PB: predicated region body
PF: predicated region fallthrough
CT: control target
= control target key end

     0   :  { %6 = vsyncpa [#allocation3], 0  ;;  %s130_s0 = inlined_call_operand.hbm [shape: f32[1,1024], index: 0, kind: input, shape index: {}]   ;;  %s131_s1 = inlined_call_operand.hbm [shape: f32[1,1024], index: 1, kind: output, shape index: {}]  }
   0x1   :  { %7 = vsyncpa [#allocation4], 0  ;;  %s94_s6 = smov [#allocation2]   ;;  %s46_s10 = scalar_lea.hbm %s130_s0, 128 }
   0x2   :  { %s14_s7 = sshll.u32 %s94_s6, 4  ;;  %p47_p0 = scmp.ne.s32.totalorder %s130_s0, %s46_s10  ;;  %s15_s7 = int_to_ptr.vmem [resolvable:$true] %s14_s7 }
   0x3   :  { %p50_p1 = scmp.lt.u32.totalorder %s46_s10, %s130_s0 }
   0x5   :  { %p52_p2 = pnand %p50_p1, %p47_p0 }
   0x7   :  { %55 = shalt.err (!%p52_p2)
}
   0x8   :  { %s56_s15 = scalar_lea.vmem %s15_s7, 128  ;;  %p61_p4 = scmp.lt.s32.totalorder %s15_s7, %s15_s7 }
   0x9   :  { %p57_p3 = scmp.ne.s32.totalorder %s15_s7, %s56_s15  ;;  %p62_p5 = scmp.lt.s32.totalorder %s56_s15, %s56_s15 }
   0xb   :  { %p63_p6 = por %p62_p5, %p61_p4 }
   0xd   :  { %p64_p7 = pnand %p63_p6, %p57_p3 }
   0xf   :  { %67 = shalt.err (!%p64_p7)
}
  0x10   :  { %17 = dma.hbm_to_vmem [thread:$0]  %s130_s0, 128, %s15_s7, [#allocation3]  }
  0x11   :  { %90 = dma.done.wait [#allocation3], 128  }
  0x12   :  { %91 = vsyncadd [#allocation3], 4294967168  ;;  %v21_v0 = vld [vmem:[#allocation2] sm:$0xff]  ;;  %s95_s18 = smov [#allocation5]  }
  0x13   :  { %v22_v1 = vmul.f32 0.5, %v21_v0  ;;  %s33_s19 = sshll.u32 %s95_s18, 4  ;;  %s34_s19 = int_to_ptr.vmem [resolvable:$true] %s33_s19 }
  0x14   :  { %s68_s20 = scalar_lea.vmem %s34_s19, 128  ;;  %p73_p9 = scmp.lt.s32.totalorder %s34_s19, %s34_s19 }
  0x15   :  { %44 = vtanh.f32 %v22_v1  ;;  %p69_p8 = scmp.ne.s32.totalorder %s34_s19, %s68_s20  ;;  %p74_p10 = scmp.lt.s32.totalorder %s68_s20, %s68_s20 }
  0x17   :  { %p75_p11 = por %p74_p10, %p73_p9 }
  0x19   :  { %p76_p12 = pnand %p75_p11, %p69_p8 }
  0x1f   :  { %v45_v2 = vpop.eup %44 }
  0x20   :  { %v24_v3 = vmul.f32 0.5, %v45_v2 }
  0x22   :  { %v25_v4 = vadd.f32 0.5, %v24_v3 }
  0x24   :  { %26 = vst [vmem:[#allocation5] sm:$0xff] %v25_v4 }
  0x25   :  { %79 = shalt.err (!%p76_p12)
}
  0x26   :  { %s80_s22 = scalar_lea.hbm %s131_s1, 128 }
  0x27   :  { %p81_p13 = scmp.ne.s32.totalorder %s131_s1, %s80_s22  ;;  %p84_p0 = scmp.lt.u32.totalorder %s80_s22, %s131_s1 }
  0x29   :  { %p86_p1 = pnand %p84_p0, %p81_p13 }
  0x2b   :  { %89 = shalt.err (!%p86_p1)
}
  0x2c   :  { %36 = dma.vmem_to_hbm [thread:$0]  %s34_s19, 128, %s131_s1, [#allocation4]  }
  0x2d   :  { %92 = dma.done.wait [#allocation4], 128  }
  0x2e   :  { %93 = vsyncadd [#allocation4], 4294967168 }
  0x2f   :  { %40 = vsyncpa [#allocation3], 1 }
  0x30   :  { %41 = vsyncpa [#allocation4], 1 }

</bundles_post_ra>
